<compile_context>
chip_gen: v6e
topology: v6e:2x2x1
jax: 0.10.0
libtpu: 0.0.40
codegen_flags: <defaults>
</compile_context>

<pallas_src>
import functools

import jax
import jax.numpy as jnp
from jax import lax
from jax.experimental import pallas as pl
from jax.experimental.pallas import tpu as pltpu


def _layer_norm(x, eps=1e-5):
    # Single-pass LN: two fused mean reductions, var = E[x^2] - E[x]^2.
    m1 = jnp.mean(x, axis=-1, keepdims=True)
    m2 = jnp.mean(x * x, axis=-1, keepdims=True)
    var = jnp.maximum(m2 - m1 * m1, 0.0)
    return (x - m1) * lax.rsqrt(var + eps)


def actor_discrete_kernel(obs_ref,
                          w1_ref, b1_ref,
                          w2_ref, b2_ref,
                          w3_ref, b3_ref,
                          out_ref):
    # NOTE: the feature_norm trick is dead code in the original forward (its
    # result is discarded), so it is intentionally not applied here.
    obs = obs_ref[...]

    # l1 + relu + LayerNorm   (bf16 MXU inputs, f32 accumulation)
    h = jnp.dot(obs.astype(jnp.bfloat16), w1_ref[...],
                preferred_element_type=jnp.float32) + b1_ref[...]
    h = jnp.maximum(h, 0.0)
    h = _layer_norm(h)

    # l2 + relu + LayerNorm
    h = jnp.dot(h.astype(jnp.bfloat16), w2_ref[...],
                preferred_element_type=jnp.float32) + b2_ref[...]
    h = jnp.maximum(h, 0.0)
    h = _layer_norm(h)

    # l3 + softmax over the action dim
    logits = jnp.dot(h.astype(jnp.bfloat16), w3_ref[...],
                     preferred_element_type=jnp.float32) + b3_ref[...]
    m = jnp.max(logits, axis=-1, keepdims=True)
    e = jnp.exp(logits - m)
    denom = jnp.sum(e, axis=-1, keepdims=True)
    out_ref[...] = (e * pl.reciprocal(denom, approx=True)).astype(out_ref.dtype)


def _round_up(x, m):
    return ((x + m - 1) // m) * m


@functools.partial(jax.jit, static_argnames=("block_b",))
def actor_discrete_forward(obs, w1, b1, w2, b2, w3, b3, block_b=1024):
    """obs: (B, obs_dim) f32; w*: (in, out) already-transposed; b*: (1, out) f32."""
    B, obs_dim = obs.shape
    h1 = w1.shape[1]
    h2 = w2.shape[1]
    action_dim = w3.shape[1]

    # Batch tile: multiple of 8 (sublane granularity), capped for VMEM headroom.
    tb = min(block_b, _round_up(B, 8))
    grid = (pl.cdiv(B, tb),)

    # Cast weights to bf16 once in the wrapper (halves weight DMA, native MXU).
    w1b = w1.astype(jnp.bfloat16)
    w2b = w2.astype(jnp.bfloat16)
    w3b = w3.astype(jnp.bfloat16)

    resident = lambda shape: pl.BlockSpec(shape, lambda i: (0, 0))

    return pl.pallas_call(
        actor_discrete_kernel,
        out_shape=jax.ShapeDtypeStruct((B, action_dim), jnp.float32),
        grid=grid,
        in_specs=[
            pl.BlockSpec((tb, obs_dim), lambda i: (i, 0)),   # obs: tiled on batch
            resident((obs_dim, h1)), resident((1, h1)),      # w1, b1 (VMEM-resident)
            resident((h1, h2)),      resident((1, h2)),      # w2, b2
            resident((h2, action_dim)), resident((1, action_dim)),  # w3, b3
        ],
        out_specs=pl.BlockSpec((tb, action_dim), lambda i: (i, 0)),
        compiler_params=pltpu.CompilerParams(
            dimension_semantics=("parallel",),
        ),
    )(obs, w1b, b1, w2b, b2, w3b, b3)


def init_params(key, obs_dim, action_dim, hidden_1=128, hidden_2=128):
    """Orthogonal init (gain = calculate_gain('relu') = sqrt(2) for l1/l2,
    gain = 0.01 for the output layer l3), zero biases — matches net_init()."""
    k1, k2, k3 = jax.random.split(key, 3)
    relu_gain = float(jnp.sqrt(2.0))
    orth = jax.nn.initializers.orthogonal

    # PyTorch Linear weight is (out, in); orthogonal_ is applied on that shape.
    # Init in (out, in), then transpose to (in, out) for the kernel.
    w1 = orth(relu_gain)(k1, (hidden_1, obs_dim), jnp.float32).T
    w2 = orth(relu_gain)(k2, (hidden_2, hidden_1), jnp.float32).T
    w3 = orth(0.01)(k3, (action_dim, hidden_2), jnp.float32).T
    b1 = jnp.zeros((1, hidden_1), jnp.float32)
    b2 = jnp.zeros((1, hidden_2), jnp.float32)
    b3 = jnp.zeros((1, action_dim), jnp.float32)
    return w1, b1, w2, b2, w3, b3


def reference_forward(obs, w1, b1, w2, b2, w3, b3):
    """Pure-JAX f32 reference (same math, full precision) for correctness."""
    h = jnp.maximum(obs @ w1 + b1, 0.0)
    h = _layer_norm(h)
    h = jnp.maximum(h @ w2 + b2, 0.0)
    h = _layer_norm(h)
    return jax.nn.softmax(h @ w3 + b3, axis=1)


if __name__ == "__main__":
    key = jax.random.PRNGKey(0)
    k_obs, k_params = jax.random.split(key)

    batch = 8
    obs_dim = 32
    action_dim = 8
    hidden_1 = 128
    hidden_2 = 128

    obs = jax.random.normal(k_obs, (batch, obs_dim), dtype=jnp.float32)
    params = init_params(k_params, obs_dim, action_dim, hidden_1, hidden_2)

    a_prob = actor_discrete_forward(obs, *params)
    a_prob = jax.block_until_ready(a_prob)

    ref = reference_forward(obs, *params)
    assert a_prob.shape == (batch, action_dim)
    # Tolerances relaxed vs. the f32 reference: bf16 MXU inputs (~4e-3 rel) and
    # approx reciprocal (~1e-3 rel) in the softmax denominator.
    assert jnp.allclose(jnp.sum(a_prob, axis=1), 1.0, atol=1e-2)
    assert jnp.allclose(a_prob, ref, atol=2e-2, rtol=2e-2)

    print("KERNEL_OK")
</pallas_src>

<mosaic_0001>
module attributes {stable_mosaic.version = 11 : i64} {
  func.func @actor_discrete_kernel(%arg0: i32, %arg1: memref<8x32xf32, #tpu.memory_space<vmem>>, %arg2: memref<32x128xbf16, #tpu.memory_space<vmem>>, %arg3: memref<1x128xf32, #tpu.memory_space<vmem>>, %arg4: memref<128x128xbf16, #tpu.memory_space<vmem>>, %arg5: memref<1x128xf32, #tpu.memory_space<vmem>>, %arg6: memref<128x8xbf16, #tpu.memory_space<vmem>>, %arg7: memref<1x8xf32, #tpu.memory_space<vmem>>, %arg8: memref<8x8xf32, #tpu.memory_space<vmem>>) attributes {dimension_semantics = [#tpu.dimension_semantics<parallel>], iteration_bounds = array<i64: 1>, scalar_prefetch = 0 : i64, scratch_operands = 0 : i64, tpu.core_type = #tpu.core_type<tc>, window_params = [{transform_indices = @transform_0, window_bounds = array<i64: 8, 32>}, {pipeline_mode = #tpu.pipeline_mode<synchronous>, transform_indices = @transform_1, window_bounds = array<i64: 32, 128>}, {pipeline_mode = #tpu.pipeline_mode<synchronous>, transform_indices = @transform_2, window_bounds = array<i64: 1, 128>}, {pipeline_mode = #tpu.pipeline_mode<synchronous>, transform_indices = @transform_3, window_bounds = array<i64: 128, 128>}, {pipeline_mode = #tpu.pipeline_mode<synchronous>, transform_indices = @transform_4, window_bounds = array<i64: 1, 128>}, {pipeline_mode = #tpu.pipeline_mode<synchronous>, transform_indices = @transform_5, window_bounds = array<i64: 128, 8>}, {pipeline_mode = #tpu.pipeline_mode<synchronous>, transform_indices = @transform_6, window_bounds = array<i64: 1, 8>}, {transform_indices = @transform_7, window_bounds = array<i64: 8, 8>}]} {
    %c0 = arith.constant 0 : index
    %c0_0 = arith.constant 0 : index
    %0 = vector.load %arg1[%c0, %c0_0] : memref<8x32xf32, #tpu.memory_space<vmem>>, vector<8x32xf32>
    %1 = arith.truncf %0 : vector<8x32xf32> to vector<8x32xbf16>
    %c0_1 = arith.constant 0 : index
    %c0_2 = arith.constant 0 : index
    %2 = vector.load %arg2[%c0_1, %c0_2] : memref<32x128xbf16, #tpu.memory_space<vmem>>, vector<32x128xbf16>
    %cst = arith.constant dense<0.000000e+00> : vector<8x128xf32>
    %3 = tpu.matmul %1, %2, %cst {dimension_numbers = #tpu.dot_dimension_numbers<[1], [0], [0], [1], [0, 0, 1, 1], [], []>} : vector<8x32xbf16>, vector<32x128xbf16>, vector<8x128xf32> -> vector<8x128xf32>
    %c0_3 = arith.constant 0 : index
    %c0_4 = arith.constant 0 : index
    %4 = vector.load %arg3[%c0_3, %c0_4] : memref<1x128xf32, #tpu.memory_space<vmem>>, vector<1x128xf32>
    %5 = vector.broadcast %4 : vector<1x128xf32> to vector<8x128xf32>
    %6 = arith.addf %3, %5 : vector<8x128xf32>
    %cst_5 = arith.constant 0.000000e+00 : f32
    %7 = vector.broadcast %cst_5 : f32 to vector<8x128xf32>
    %8 = arith.maximumf %6, %7 : vector<8x128xf32>
    %cst_6 = arith.constant dense<0.000000e+00> : vector<8xf32>
    %9 = vector.multi_reduction <add>, %8, %cst_6 [1] : vector<8x128xf32> to vector<8xf32>
    %10 = vector.shape_cast %9 : vector<8xf32> to vector<8x1xf32>
    %cst_7 = arith.constant 1.280000e+02 : f32
    %11 = vector.broadcast %cst_7 : f32 to vector<8x1xf32>
    %12 = arith.divf %10, %11 : vector<8x1xf32>
    %13 = arith.mulf %8, %8 : vector<8x128xf32>
    %cst_8 = arith.constant dense<0.000000e+00> : vector<8xf32>
    %14 = vector.multi_reduction <add>, %13, %cst_8 [1] : vector<8x128xf32> to vector<8xf32>
    %15 = vector.shape_cast %14 : vector<8xf32> to vector<8x1xf32>
    %cst_9 = arith.constant 1.280000e+02 : f32
    %16 = vector.broadcast %cst_9 : f32 to vector<8x1xf32>
    %17 = arith.divf %15, %16 : vector<8x1xf32>
    %18 = arith.mulf %12, %12 : vector<8x1xf32>
    %19 = arith.subf %17, %18 : vector<8x1xf32>
    %cst_10 = arith.constant 0.000000e+00 : f32
    %20 = vector.broadcast %cst_10 : f32 to vector<8x1xf32>
    %21 = arith.maximumf %19, %20 : vector<8x1xf32>
    %22 = vector.broadcast %12 : vector<8x1xf32> to vector<8x128xf32>
    %23 = arith.subf %8, %22 : vector<8x128xf32>
    %cst_11 = arith.constant 9.99999974E-6 : f32
    %24 = vector.broadcast %cst_11 : f32 to vector<8x1xf32>
    %25 = arith.addf %21, %24 : vector<8x1xf32>
    %26 = math.rsqrt %25 : vector<8x1xf32>
    %27 = vector.broadcast %26 : vector<8x1xf32> to vector<8x128xf32>
    %28 = arith.mulf %23, %27 : vector<8x128xf32>
    %29 = arith.truncf %28 : vector<8x128xf32> to vector<8x128xbf16>
    %c0_12 = arith.constant 0 : index
    %c0_13 = arith.constant 0 : index
    %30 = vector.load %arg4[%c0_12, %c0_13] : memref<128x128xbf16, #tpu.memory_space<vmem>>, vector<128x128xbf16>
    %cst_14 = arith.constant dense<0.000000e+00> : vector<8x128xf32>
    %31 = tpu.matmul %29, %30, %cst_14 {dimension_numbers = #tpu.dot_dimension_numbers<[1], [0], [0], [1], [0, 0, 1, 1], [], []>} : vector<8x128xbf16>, vector<128x128xbf16>, vector<8x128xf32> -> vector<8x128xf32>
    %c0_15 = arith.constant 0 : index
    %c0_16 = arith.constant 0 : index
    %32 = vector.load %arg5[%c0_15, %c0_16] : memref<1x128xf32, #tpu.memory_space<vmem>>, vector<1x128xf32>
    %33 = vector.broadcast %32 : vector<1x128xf32> to vector<8x128xf32>
    %34 = arith.addf %31, %33 : vector<8x128xf32>
    %cst_17 = arith.constant 0.000000e+00 : f32
    %35 = vector.broadcast %cst_17 : f32 to vector<8x128xf32>
    %36 = arith.maximumf %34, %35 : vector<8x128xf32>
    %cst_18 = arith.constant dense<0.000000e+00> : vector<8xf32>
    %37 = vector.multi_reduction <add>, %36, %cst_18 [1] : vector<8x128xf32> to vector<8xf32>
    %38 = vector.shape_cast %37 : vector<8xf32> to vector<8x1xf32>
    %cst_19 = arith.constant 1.280000e+02 : f32
    %39 = vector.broadcast %cst_19 : f32 to vector<8x1xf32>
    %40 = arith.divf %38, %39 : vector<8x1xf32>
    %41 = arith.mulf %36, %36 : vector<8x128xf32>
    %cst_20 = arith.constant dense<0.000000e+00> : vector<8xf32>
    %42 = vector.multi_reduction <add>, %41, %cst_20 [1] : vector<8x128xf32> to vector<8xf32>
    %43 = vector.shape_cast %42 : vector<8xf32> to vector<8x1xf32>
    %cst_21 = arith.constant 1.280000e+02 : f32
    %44 = vector.broadcast %cst_21 : f32 to vector<8x1xf32>
    %45 = arith.divf %43, %44 : vector<8x1xf32>
    %46 = arith.mulf %40, %40 : vector<8x1xf32>
    %47 = arith.subf %45, %46 : vector<8x1xf32>
    %cst_22 = arith.constant 0.000000e+00 : f32
    %48 = vector.broadcast %cst_22 : f32 to vector<8x1xf32>
    %49 = arith.maximumf %47, %48 : vector<8x1xf32>
    %50 = vector.broadcast %40 : vector<8x1xf32> to vector<8x128xf32>
    %51 = arith.subf %36, %50 : vector<8x128xf32>
    %cst_23 = arith.constant 9.99999974E-6 : f32
    %52 = vector.broadcast %cst_23 : f32 to vector<8x1xf32>
    %53 = arith.addf %49, %52 : vector<8x1xf32>
    %54 = math.rsqrt %53 : vector<8x1xf32>
    %55 = vector.broadcast %54 : vector<8x1xf32> to vector<8x128xf32>
    %56 = arith.mulf %51, %55 : vector<8x128xf32>
    %57 = arith.truncf %56 : vector<8x128xf32> to vector<8x128xbf16>
    %c0_24 = arith.constant 0 : index
    %c0_25 = arith.constant 0 : index
    %58 = vector.load %arg6[%c0_24, %c0_25] : memref<128x8xbf16, #tpu.memory_space<vmem>>, vector<128x8xbf16>
    %cst_26 = arith.constant dense<0.000000e+00> : vector<8x8xf32>
    %59 = tpu.matmul %57, %58, %cst_26 {dimension_numbers = #tpu.dot_dimension_numbers<[1], [0], [0], [1], [0, 0, 1, 1], [], []>} : vector<8x128xbf16>, vector<128x8xbf16>, vector<8x8xf32> -> vector<8x8xf32>
    %c0_27 = arith.constant 0 : index
    %c0_28 = arith.constant 0 : index
    %60 = vector.load %arg7[%c0_27, %c0_28] : memref<1x8xf32, #tpu.memory_space<vmem>>, vector<1x8xf32>
    %61 = vector.broadcast %60 : vector<1x8xf32> to vector<8x8xf32>
    %62 = arith.addf %59, %61 : vector<8x8xf32>
    %cst_29 = arith.constant dense<0xFF800000> : vector<8xf32>
    %63 = vector.multi_reduction <maximumf>, %62, %cst_29 [1] : vector<8x8xf32> to vector<8xf32>
    %64 = vector.shape_cast %63 : vector<8xf32> to vector<8x1xf32>
    %65 = vector.broadcast %64 : vector<8x1xf32> to vector<8x8xf32>
    %66 = arith.subf %62, %65 : vector<8x8xf32>
    %67 = math.exp %66 : vector<8x8xf32>
    %cst_30 = arith.constant dense<0.000000e+00> : vector<8xf32>
    %68 = vector.multi_reduction <add>, %67, %cst_30 [1] : vector<8x8xf32> to vector<8xf32>
    %69 = vector.shape_cast %68 : vector<8xf32> to vector<8x1xf32>
    %70 = tpu.reciprocal %69 {approx = true} : vector<8x1xf32> -> vector<8x1xf32>
    %71 = vector.broadcast %70 : vector<8x1xf32> to vector<8x8xf32>
    %72 = arith.mulf %67, %71 : vector<8x8xf32>
    %c0_31 = arith.constant 0 : index
    %c0_32 = arith.constant 0 : index
    %73 = vector.load %arg8[%c0_31, %c0_32] : memref<8x8xf32, #tpu.memory_space<vmem>>, vector<8x8xf32>
    tpu.vector_store %arg8[%c0_31, %c0_32], %72 {strides = array<i32>} : memref<8x8xf32, #tpu.memory_space<vmem>>, vector<8x8xf32>,
    return
  }
  func.func @transform_0(%arg0: i32) -> (i32, i32) {
    %c0_i32 = arith.constant 0 : i32
    %c0_i32_0 = arith.constant 0 : i32
    return %arg0, %c0_i32 : i32, i32
  }
  func.func @transform_1(%arg0: i32) -> (i32, i32) {
    %c0_i32 = arith.constant 0 : i32
    %c0_i32_0 = arith.constant 0 : i32
    %c0_i32_1 = arith.constant 0 : i32
    return %c0_i32, %c0_i32_0 : i32, i32
  }
  func.func @transform_2(%arg0: i32) -> (i32, i32) {
    %c0_i32 = arith.constant 0 : i32
    %c0_i32_0 = arith.constant 0 : i32
    %c0_i32_1 = arith.constant 0 : i32
    return %c0_i32, %c0_i32_0 : i32, i32
  }
  func.func @transform_3(%arg0: i32) -> (i32, i32) {
    %c0_i32 = arith.constant 0 : i32
    %c0_i32_0 = arith.constant 0 : i32
    %c0_i32_1 = arith.constant 0 : i32
    return %c0_i32, %c0_i32_0 : i32, i32
  }
  func.func @transform_4(%arg0: i32) -> (i32, i32) {
    %c0_i32 = arith.constant 0 : i32
    %c0_i32_0 = arith.constant 0 : i32
    %c0_i32_1 = arith.constant 0 : i32
    return %c0_i32, %c0_i32_0 : i32, i32
  }
  func.func @transform_5(%arg0: i32) -> (i32, i32) {
    %c0_i32 = arith.constant 0 : i32
    %c0_i32_0 = arith.constant 0 : i32
    %c0_i32_1 = arith.constant 0 : i32
    return %c0_i32, %c0_i32_0 : i32, i32
  }
  func.func @transform_6(%arg0: i32) -> (i32, i32) {
    %c0_i32 = arith.constant 0 : i32
    %c0_i32_0 = arith.constant 0 : i32
    %c0_i32_1 = arith.constant 0 : i32
    return %c0_i32, %c0_i32_0 : i32, i32
  }
  func.func @transform_7(%arg0: i32) -> (i32, i32) {
    %c0_i32 = arith.constant 0 : i32
    %c0_i32_0 = arith.constant 0 : i32
    return %arg0, %c0_i32 : i32, i32
  }
}

</mosaic_0001>

<bundles_post_ra>
// kernel: actor_discrete_forward.1
= control target key start
LH: loop header
LB: loop body
LE: loop exit
PB: predicated region body
PF: predicated region fallthrough
CT: control target
= control target key end

     0   :  { %v521_v1 = vmov 0.0   ;;  %vm522_vm0 = vmmov 0   ;;  %vm53_vm1 = vcmask 261120   ;;  %s657_s0 = inlined_call_operand.vmem [shape: f32[8,32], index: 0, kind: input, shape index: {}]   ;;  %s658_s1 = inlined_call_operand.vmem [shape: bf16[32,128], index: 1, kind: input, shape index: {}]   ;;  %s659_s2 = inlined_call_operand.vmem [shape: f32[1,128], index: 2, kind: input, shape index: {}]   ;;  %s660_s3 = inlined_call_operand.vmem [shape: bf16[128,128], index: 3, kind: input, shape index: {}]   ;;  %s661_s4 = inlined_call_operand.vmem [shape: f32[1,128], index: 4, kind: input, shape index: {}]   ;;  %s662_s5 = inlined_call_operand.vmem [shape: bf16[128,8], index: 5, kind: input, shape index: {}]   ;;  %s663_s6 = inlined_call_operand.vmem [shape: f32[1,8], index: 6, kind: input, shape index: {}]   ;;  %s664_s7 = inlined_call_operand.hbm [shape: f32[8,8], index: 7, kind: output, shape index: {}]  }
   0x1   :  { %v473_v0 = vld [vmem:[%s658_s1 + $0x8] sm:$0xff]   ;;  %422 = vmatprep.subr.bf16.mxu0 %v521_v1  ;;  %430 = vmatprep.subr.bf16.mxu1 %v521_v1  ;;  %v474_v2 = vld [vmem:[%s658_s1] sm:$0xff]  }
   0x2   :  { %423 = vmatpush3.bf16.msra.mxu0 %v473_v0  ;;  %426 = vmatprep.mubr.msk.bf16.mxu0 %vm522_vm0, %v521_v1  ;;  %v28_v3 = vld [vmem:[%s657_s0] sm:$0xff] }
   0x3   :  { %424 = vmatprep.subr.bf16.mxu0 %v521_v1  ;;  %446 = vmatprep.mubr.msk.bf16.mxu1 %vm522_vm0, %v521_v1  ;;  %v29_v4 = vpack.c.bf16 %v28_v3, %v28_v3 }
   0x6   :  { %425 = vmatpush3.bf16.msra.mxu0 %v474_v2 }
   0x7   :  { %450 = vmatprep.subr.bf16.mxu0 %v521_v1 }
   0x9   :  { %427 = vmatmul.mubr.msk.bf16.vlgmr.msra.gmra.mxu0 %vm53_vm1, %v29_v4 }
   0xa   :  { %466 = vmatprep.mubr.msk.bf16.mxu0 %vm522_vm0, %v521_v1 }
   0xb   :  { %12 = vsyncpa [#allocation3], 0  ;;  %v475_v5 = vld [vmem:[%s660_s3 + $0x38] sm:$0xff]   ;;  %v379_v6 = vld [vmem:[%s659_s2] ss:$0 sm:$0xff]  ;;  %vm352_vm2 = vcmask 64512  }
   0xc   :  { %431 = vmatpush3.bf16.msra.mxu1 %v475_v5  ;;  %v476_v14 = vld [vmem:[%s660_s3 + $0x30] sm:$0xff]   ;;  %v477_v15 = vld [vmem:[%s660_s3 + $0x28] sm:$0xff]   ;;  %v478_v16 = vld [vmem:[%s660_s3 + $0x20] sm:$0xff]  }
   0xd   :  { %432 = vmatprep.subr.bf16.mxu1 %v521_v1  ;;  %v479_v17 = vld [vmem:[%s660_s3 + $0x18] sm:$0xff]   ;;  %v480_v18 = vld [vmem:[%s660_s3 + $0x10] sm:$0xff]   ;;  %v481_v19 = vld [vmem:[%s660_s3 + $0x8] sm:$0xff]  }
   0xe   :  { %v482_v20 = vld [vmem:[%s660_s3] sm:$0xff]   ;;  %v483_v33 = vld [vmem:[%s662_s5 + $0x38] sm:$0xff]   ;;  %v484_v42 = vld [vmem:[%s662_s5 + $0x30] sm:$0xff]  }
   0xf   :  { %451 = vmatpush3.bf16.msra.mxu0 %v483_v33  ;;  %v383_v34 = vld [vmem:[%s661_s4] ss:$0 sm:$0xff]  ;;  %v485_v43 = vld [vmem:[%s662_s5 + $0x28] sm:$0xff]   ;;  %v487_v45 = vld [vmem:[%s662_s5 + $0x18] sm:$0xff]  }
  0x10   :  { %433 = vmatpush3.bf16.msra.mxu1 %v476_v14  ;;  %452 = vmatprep.subr.bf16.mxu0 %v521_v1  ;;  %v486_v44 = vld [vmem:[%s662_s5 + $0x20] sm:$0xff]   ;;  %v488_v46 = vld [vmem:[%s662_s5 + $0x10] sm:$0xff]   ;;  %v489_v47 = vld [vmem:[%s662_s5 + $0x8] sm:$0xff]  }
  0x11   :  { %434 = vmatprep.subr.bf16.mxu1 %v521_v1  ;;  %v490_v48 = vld [vmem:[%s662_s5] sm:$0xff]   ;;  %s523_s5 = smov [#allocation2]  }
  0x12   :  { %v392_v61 = vld [vmem:[%s663_s6] ss:$0 sm:$0xff]  ;;  %s371_s6 = sshll.u32 %s523_s5, 4  ;;  %s372_s6 = int_to_ptr.vmem [resolvable:$true] %s371_s6 }
  0x13   :  { %453 = vmatpush3.bf16.msra.mxu0 %v484_v42  ;;  %s499_s14 = scalar_lea.vmem %s372_s6, 128  ;;  %p504_p1 = scmp.lt.s32.totalorder %s372_s6, %s372_s6 }
  0x14   :  { %435 = vmatpush3.bf16.msra.mxu1 %v477_v15  ;;  %454 = vmatprep.subr.bf16.mxu0 %v521_v1  ;;  %p500_p0 = scmp.ne.s32.totalorder %s372_s6, %s499_s14  ;;  %p505_p2 = scmp.lt.s32.totalorder %s499_s14, %s499_s14 }
  0x15   :  { %436 = vmatprep.subr.bf16.mxu1 %v521_v1 }
  0x16   :  { %p506_p3 = por %p505_p2, %p504_p1 }
  0x17   :  { %455 = vmatpush3.bf16.msra.mxu0 %v485_v43 }
  0x18   :  { %437 = vmatpush3.bf16.msra.mxu1 %v478_v16  ;;  %456 = vmatprep.subr.bf16.mxu0 %v521_v1  ;;  %p507_p4 = pnand %p506_p3, %p500_p0 }
  0x19   :  { %438 = vmatprep.subr.bf16.mxu1 %v521_v1 }
  0x1b   :  { %457 = vmatpush3.bf16.msra.mxu0 %v486_v44 }
  0x1c   :  { %439 = vmatpush3.bf16.msra.mxu1 %v479_v17  ;;  %458 = vmatprep.subr.bf16.mxu0 %v521_v1 }
  0x1d   :  { %440 = vmatprep.subr.bf16.mxu1 %v521_v1 }
  0x1f   :  { %459 = vmatpush3.bf16.msra.mxu0 %v487_v45 }
  0x20   :  { %441 = vmatpush3.bf16.msra.mxu1 %v480_v18  ;;  %460 = vmatprep.subr.bf16.mxu0 %v521_v1 }
  0x21   :  { %442 = vmatprep.subr.bf16.mxu1 %v521_v1 }
  0x23   :  { %461 = vmatpush3.bf16.msra.mxu0 %v488_v46 }
  0x24   :  { %443 = vmatpush3.bf16.msra.mxu1 %v481_v19  ;;  %462 = vmatprep.subr.bf16.mxu0 %v521_v1 }
  0x25   :  { %444 = vmatprep.subr.bf16.mxu1 %v521_v1 }
  0x27   :  { %463 = vmatpush3.bf16.msra.mxu0 %v489_v47 }
  0x28   :  { %445 = vmatpush3.bf16.msra.mxu1 %v482_v20  ;;  %464 = vmatprep.subr.bf16.mxu0 %v521_v1 }
  0x2b   :  { %465 = vmatpush3.bf16.msra.mxu0 %v490_v48 }
  0xc9   :  { %v91_v7 = vpop.f32.mrf.mxu0 }
  0xca   :  { %v92_v8 = vadd.f32 %v379_v6, %v91_v7 }
  0xcb   :  { %v428_v9 = vpop.f32.mrf.mxu0 }
  0xcc   :  { %v97_v10 = vmax.f32 %v92_v8, 0.0 }
  0xcd   :  { %v94_v11 = vpop.f32.mrf.mxu0 }
  0xce   :  { %98 = vadd.xlane.f32.xlu0 %v97_v10  ;;  %v102_v13 = vmul.f32 %v97_v10, %v97_v10 }
  0xcf   :  { %v429_v12 = vpop.f32.mrf.mxu0 }
  0xd2   :  { %103 = vadd.xlane.f32.xlu0 %v102_v13 }
 0x157   :  { %v99_v21 = vpop.xlane.xlu0 %98 }
 0x158   :  { %v101_v22 = vmul.f32 0.0078125, %v99_v21 }
 0x15a   :  { %v106_v24 = vmul.f32 %v101_v22, %v101_v22  ;;  %v109_v29 = vsub.f32 %v97_v10, %v101_v22 }
 0x15b   :  { %v104_v23 = vpop.xlane.xlu0 %103 }
 0x15c   :  { %v105_v25 = vmul.f32 0.0078125, %v104_v23 }
 0x15e   :  { %v107_v26 = vsub.f32 %v105_v25, %v106_v24 }
 0x160   :  { %v108_v27 = vmax.f32 %v107_v26, 0.0 }
 0x162   :  { %v110_v28 = vadd.f32 1e-05, %v108_v27 }
 0x164   :  { %491 = vrsqrt.f32 %v110_v28 }
 0x171   :  { %v492_v30 = vpop.eup %491 }
 0x172   :  { %v112_v31 = vmul.f32 %v492_v30, %v109_v29 }
 0x174   :  { %v113_v32 = vpack.c.bf16 %v112_v31, %v112_v31 }
 0x176   :  { %447 = vmatmul.mubr.bf16.vlgmr.msra.gmra.mxu1 %v113_v32 }
 0x236   :  { %v219_v35 = vpop.f32.mrf.mxu1 }
 0x237   :  { %v220_v36 = vadd.f32 %v383_v34, %v219_v35 }
 0x238   :  { %v448_v37 = vpop.f32.mrf.mxu1 }
 0x239   :  { %v225_v38 = vmax.f32 %v220_v36, 0.0 }
 0x23a   :  { %v222_v39 = vpop.f32.mrf.mxu1 }
 0x23b   :  { %226 = vadd.xlane.f32.xlu1 %v225_v38  ;;  %v229_v41 = vmul.f32 %v225_v38, %v225_v38 }
 0x23c   :  { %v449_v40 = vpop.f32.mrf.mxu1 }
 0x23f   :  { %230 = vadd.xlane.f32.xlu1 %v229_v41 }
 0x2c4   :  { %v227_v49 = vpop.xlane.xlu1 %226 }
 0x2c5   :  { %v228_v50 = vmul.f32 0.0078125, %v227_v49 }
 0x2c7   :  { %v233_v52 = vmul.f32 %v228_v50, %v228_v50  ;;  %v236_v57 = vsub.f32 %v225_v38, %v228_v50 }
 0x2c8   :  { %v231_v51 = vpop.xlane.xlu1 %230 }
 0x2c9   :  { %v232_v53 = vmul.f32 0.0078125, %v231_v51 }
 0x2cb   :  { %v234_v54 = vsub.f32 %v232_v53, %v233_v52 }
 0x2cd   :  { %v235_v55 = vmax.f32 %v234_v54, 0.0 }
 0x2cf   :  { %v237_v56 = vadd.f32 1e-05, %v235_v55 }
 0x2d1   :  { %493 = vrsqrt.f32 %v237_v56 }
 0x2de   :  { %v494_v58 = vpop.eup %493 }
 0x2df   :  { %v239_v59 = vmul.f32 %v494_v58, %v236_v57 }
 0x2e1   :  { %v240_v60 = vpack.c.bf16 %v239_v59, %v239_v59 }
 0x2e3   :  { %467 = vmatmul.mubr.bf16.vlgmr.msra.gmra.mxu0 %v240_v60 }
 0x3a3   :  { %v346_v62 = vpop.f32.mrf.mxu0 }
 0x3a4   :  { %v347_v63 = vadd.f32 %v392_v61, %v346_v62 }
 0x3a5   :  { %v468_v0 = vpop.f32.mrf.mxu0 }
 0x3a6   :  { %v353_v1 = vsel %vm352_vm2, %v347_v63, -inf }
 0x3a7   :  { %354 = vmax.xlane.f32.xlu0 %v353_v1  ;;  %v349_v2 = vpop.f32.mrf.mxu0 }
 0x3a9   :  { %v469_v3 = vpop.f32.mrf.mxu0 }
 0x430   :  { %v355_v4 = vpop.xlane.xlu0 %354 }
 0x431   :  { %v356_v5 = vsub.f32 %v347_v63, %v355_v4 }
 0x433   :  { %v357_v6 = vmul.f32 1.442695, %v356_v5 }
 0x435   :  { %495 = vpow2.f32 %v357_v6 }
 0x442   :  { %v496_v7 = vpop.eup %495 }
 0x443   :  { %v359_v8 = vsel %vm352_vm2, %v496_v7, 0.0 }
 0x444   :  { %360 = vadd.xlane.f32.xlu1 %v359_v8 }
 0x4cd   :  { %v361_v9 = vpop.xlane.xlu1 %360 }
 0x4ce   :  { %497 = vrcp.f32 %v361_v9 }
 0x4db   :  { %v498_v10 = vpop.eup %497 }
 0x4dc   :  { %v363_v11 = vmul.f32 %v498_v10, %v496_v7 }
 0x4de   :  { %364 = vst.msk [vmem:[#allocation2] sm:$0xff] %vm352_vm2, %v363_v11 }
 0x4df   :  { %510 = shalt.err (!%p507_p4)
}
 0x4e0   :  { %374 = dma.vmem_to_hbm [thread:$0]  %s372_s6, 128, %s664_s7, [#allocation3]  }
 0x4e1   :  { %519 = dma.done.wait [#allocation3], 128  }
 0x4e2   :  { %520 = vsyncadd [#allocation3], 4294967168 }
 0x4e3   :  { %378 = vsyncpa [#allocation3], 1 }

</bundles_post_ra>
